<compile_context>
chip_gen: v7x
topology: tpu7x:2x2x1
jax: 0.10.0
libtpu: 0.0.40
codegen_flags: <defaults>
</compile_context>

<pallas_src>
import functools

import jax
import jax.numpy as jnp
from jax.experimental import pallas as pl
from jax.experimental.pallas import tpu as pltpu

_LANE = 128  # lane width = batch-tile granularity in the transposed layout


def _round_up(n, m):
    return ((n + m - 1) // m) * m


def _cdiv(a, b):
    return (a + b - 1) // b


def rnd_mlp_kernel(x_ref, w1_ref, b1_ref, w2_ref, b2_ref, w3_ref, b3_ref, o_ref,
                   *, compute_dtype):
    """Forward pass of one batch tile; activations transposed to (feature, batch).

    x_ref : (input_dim, tb)      f32
    w1    : (hidden, input_dim)  compute_dtype    b1: (hidden, 1)  f32
    w2    : (hidden, hidden)     compute_dtype    b2: (hidden, 1)  f32
    w3    : (out_dim, hidden)    compute_dtype    b3: (out_dim, 1) f32
    o_ref : (out_dim, tb)        f32   (lane-dense: tb % 128 == 0, no padded cols)
    """
    x = x_ref[...].astype(compute_dtype)            # no-op when compute_dtype==f32
    h = jnp.dot(w1_ref[...], x, preferred_element_type=jnp.float32) + b1_ref[...]
    h = jnp.maximum(h, 0.0)                         # ReLU in f32 (VPU)
    h = jnp.dot(w2_ref[...], h.astype(compute_dtype),
                preferred_element_type=jnp.float32) + b2_ref[...]
    h = jnp.maximum(h, 0.0)
    out = jnp.dot(w3_ref[...], h.astype(compute_dtype),
                  preferred_element_type=jnp.float32) + b3_ref[...]
    o_ref[...] = out.astype(o_ref.dtype)


def _choose_batch_tiling(batch, tb_request):
    """Pick (tile, grid, padded_batch) with tile % 128 == 0, grid*tile == padded."""
    b0 = _round_up(batch, _LANE)                          # minimum lane granularity
    tb_request = min(_round_up(max(tb_request, _LANE), _LANE), b0)
    # Keep >= 2 grid steps whenever the batch allows it, so the "parallel" axis
    # can shard across both TensorCores on v7x (harmless on v5e/v6e).
    min_steps = 2 if b0 >= 2 * _LANE else 1
    grid = max(min_steps, _cdiv(b0, tb_request))
    tb = _round_up(_cdiv(b0, grid), _LANE)                # rebalance: avoid ~2x padding
    grid = max(min_steps, _cdiv(b0, tb))
    return tb, grid, grid * tb


@functools.partial(jax.jit, static_argnames=("tb", "compute_dtype"))
def rnd_network_forward(x, params, *, tb=1024, compute_dtype=jnp.float32):
    """Pallas-backed forward pass of RNDNetwork.

    x      : (B, input_dim) float32
    params : dict w1,b1,w2,b2,w3,b3 in PyTorch nn.Linear layout (w: (out, in),
             b stored as (out, 1)).
    tb     : requested batch tile (rows per grid step), sweepable; rounded to a
             multiple of 128 and rebalanced against the actual batch.
    """
    w1, b1, w2, b2, w3, b3 = (params["w1"], params["b1"], params["w2"],
                              params["b2"], params["w3"], params["b3"])
    B, input_dim = x.shape
    hidden = w1.shape[0]
    out_dim = w3.shape[0]

    tb_eff, grid_n, B_padded = _choose_batch_tiling(B, tb)

    # Pad the batch and move it onto the lane axis: (input_dim, B_padded).
    xt = jnp.pad(x, ((0, B_padded - B), (0, 0))).T

    cd = jnp.dtype(compute_dtype)
    if cd == jnp.dtype(jnp.float32):
        w1c, w2c, w3c = w1, w2, w3          # default path: zero per-call weight prep
    else:
        w1c, w2c, w3c = w1.astype(cd), w2.astype(cd), w3.astype(cd)

    def resident(shape):
        # Grid-invariant block: DMA'd once, stays resident in VMEM for the call.
        return pl.BlockSpec(shape, lambda i: (0, 0))

    out_t = pl.pallas_call(
        functools.partial(rnd_mlp_kernel, compute_dtype=cd),
        out_shape=jax.ShapeDtypeStruct((out_dim, B_padded), jnp.float32),
        grid_spec=pltpu.PrefetchScalarGridSpec(
            num_scalar_prefetch=0,
            grid=(grid_n,),
            in_specs=[
                pl.BlockSpec((input_dim, tb_eff), lambda i: (0, i)),  # x^T, batch-tiled
                resident((hidden, input_dim)),                        # w1
                resident((hidden, 1)),                                # b1
                resident((hidden, hidden)),                           # w2
                resident((hidden, 1)),                                # b2
                resident((out_dim, hidden)),                          # w3 (unpadded)
                resident((out_dim, 1)),                               # b3 (unpadded)
            ],
            out_specs=pl.BlockSpec((out_dim, tb_eff), lambda i: (0, i)),
        ),
        compiler_params=pltpu.CompilerParams(
            # independent batch tiles -> shard across both v7x TensorCores
            dimension_semantics=("parallel",),
            # tiny working set (<3 MiB even at tb=2048, f32); 32 MiB is safe on
            # every generation (v7x physical VMEM is 64 MiB).
            vmem_limit_bytes=32 * 1024 * 1024,
        ),
    )(xt, w1c, b1, w2c, b2, w3c, b3)

    # Strip batch padding and go back to (batch, out_dim); fuses under the jit.
    return out_t[:, :B].T


def init_params(key, input_dim, output_dim, hidden_size=128):
    """PyTorch nn.Linear-style init; weights kept in the (out, in) PyTorch layout."""
    def linear(k, fan_in, fan_out):
        kw, kb = jax.random.split(k)
        bound = 1.0 / float(fan_in) ** 0.5
        w = jax.random.uniform(kw, (fan_out, fan_in), jnp.float32, -bound, bound)
        b = jax.random.uniform(kb, (fan_out, 1), jnp.float32, -bound, bound)
        return w, b

    k1, k2, k3 = jax.random.split(key, 3)
    w1, b1 = linear(k1, input_dim, hidden_size)
    w2, b2 = linear(k2, hidden_size, hidden_size)
    w3, b3 = linear(k3, hidden_size, output_dim)
    return dict(w1=w1, b1=b1, w2=w2, b2=b2, w3=w3, b3=b3)


def reference_forward(x, p):
    h = jnp.maximum(x @ p["w1"].T + p["b1"][:, 0], 0.0)
    h = jnp.maximum(h @ p["w2"].T + p["b2"][:, 0], 0.0)
    return h @ p["w3"].T + p["b3"][:, 0]


if __name__ == "__main__":
    key = jax.random.PRNGKey(0)
    kx, kp, kx2, kx3 = jax.random.split(key, 4)

    # Shapes consistent with RNDNetwork(input_dim=16, output_dim=8, hidden_size=128)
    B, input_dim, hidden, out_dim = 16, 16, 128, 8
    x = jax.random.normal(kx, (B, input_dim), jnp.float32)
    params = init_params(kp, input_dim, out_dim, hidden)
    ref = reference_forward(x, params)

    # 1) default f32 path (MXU pass ordering may differ slightly from XLA's fused
    #    dot, so compare with a small tolerance rather than bit-exactly).
    out = jax.block_until_ready(rnd_network_forward(x, params))
    assert out.shape == (B, out_dim)
    assert jnp.allclose(out, ref, atol=1e-2, rtol=1e-2), "f32 mismatch vs reference"

    # 2) bf16 MXU-operand path: looser tolerance.
    out_bf16 = jax.block_until_ready(
        rnd_network_forward(x, params, compute_dtype=jnp.bfloat16))
    assert out_bf16.shape == (B, out_dim)
    assert jnp.allclose(out_bf16, ref, atol=5e-2, rtol=5e-2), "bf16 mismatch"

    # 3) awkward batch size: exercises the batch-padding path.
    B2 = 13
    x2 = jax.random.normal(kx2, (B2, input_dim), jnp.float32)
    out2 = jax.block_until_ready(rnd_network_forward(x2, params))
    ref2 = reference_forward(x2, params)
    assert out2.shape == (B2, out_dim)
    assert jnp.allclose(out2, ref2, atol=1e-2, rtol=1e-2), "padded-batch mismatch"

    # 4) batch big enough for a multi-step ("parallel") grid.
    B3 = 300
    x3 = jax.random.normal(kx3, (B3, input_dim), jnp.float32)
    out3 = jax.block_until_ready(rnd_network_forward(x3, params))
    ref3 = reference_forward(x3, params)
    assert out3.shape == (B3, out_dim)
    assert jnp.allclose(out3, ref3, atol=1e-2, rtol=1e-2), "multi-tile mismatch"

    print("KERNEL_OK")
</pallas_src>

<mosaic_0001>
module attributes {stable_mosaic.version = 11 : i64} {
  func.func @rnd_mlp_kernel(%arg0: i32, %arg1: memref<16x128xf32, #tpu.memory_space<vmem>>, %arg2: memref<128x16xf32, #tpu.memory_space<vmem>>, %arg3: memref<128x1xf32, #tpu.memory_space<vmem>>, %arg4: memref<128x128xf32, #tpu.memory_space<vmem>>, %arg5: memref<128x1xf32, #tpu.memory_space<vmem>>, %arg6: memref<8x128xf32, #tpu.memory_space<vmem>>, %arg7: memref<8x1xf32, #tpu.memory_space<vmem>>, %arg8: memref<8x128xf32, #tpu.memory_space<vmem>>) attributes {dimension_semantics = [#tpu.dimension_semantics<parallel>], iteration_bounds = array<i64: 1>, scalar_prefetch = 0 : i64, scratch_operands = 0 : i64, tpu.core_type = #tpu.core_type<tc>, window_params = [{transform_indices = @transform_0, window_bounds = array<i64: 16, 128>}, {pipeline_mode = #tpu.pipeline_mode<synchronous>, transform_indices = @transform_1, window_bounds = array<i64: 128, 16>}, {pipeline_mode = #tpu.pipeline_mode<synchronous>, transform_indices = @transform_2, window_bounds = array<i64: 128, 1>}, {pipeline_mode = #tpu.pipeline_mode<synchronous>, transform_indices = @transform_3, window_bounds = array<i64: 128, 128>}, {pipeline_mode = #tpu.pipeline_mode<synchronous>, transform_indices = @transform_4, window_bounds = array<i64: 128, 1>}, {pipeline_mode = #tpu.pipeline_mode<synchronous>, transform_indices = @transform_5, window_bounds = array<i64: 8, 128>}, {pipeline_mode = #tpu.pipeline_mode<synchronous>, transform_indices = @transform_6, window_bounds = array<i64: 8, 1>}, {transform_indices = @transform_7, window_bounds = array<i64: 8, 128>}]} {
    %c0 = arith.constant 0 : index
    %c0_0 = arith.constant 0 : index
    %0 = vector.load %arg1[%c0, %c0_0] : memref<16x128xf32, #tpu.memory_space<vmem>>, vector<16x128xf32>
    %c0_1 = arith.constant 0 : index
    %c0_2 = arith.constant 0 : index
    %1 = vector.load %arg2[%c0_1, %c0_2] : memref<128x16xf32, #tpu.memory_space<vmem>>, vector<128x16xf32>
    %cst = arith.constant dense<0.000000e+00> : vector<128x128xf32>
    %2 = tpu.matmul %1, %0, %cst {dimension_numbers = #tpu.dot_dimension_numbers<[1], [0], [0], [1], [0, 0, 1, 1], [], []>} : vector<128x16xf32>, vector<16x128xf32>, vector<128x128xf32> -> vector<128x128xf32>
    %c0_3 = arith.constant 0 : index
    %c0_4 = arith.constant 0 : index
    %3 = vector.load %arg3[%c0_3, %c0_4] : memref<128x1xf32, #tpu.memory_space<vmem>>, vector<128x1xf32>
    %4 = vector.broadcast %3 : vector<128x1xf32> to vector<128x128xf32>
    %5 = arith.addf %2, %4 : vector<128x128xf32>
    %cst_5 = arith.constant 0.000000e+00 : f32
    %6 = vector.broadcast %cst_5 : f32 to vector<128x128xf32>
    %7 = arith.maximumf %5, %6 : vector<128x128xf32>
    %c0_6 = arith.constant 0 : index
    %c0_7 = arith.constant 0 : index
    %8 = vector.load %arg4[%c0_6, %c0_7] : memref<128x128xf32, #tpu.memory_space<vmem>>, vector<128x128xf32>
    %cst_8 = arith.constant dense<0.000000e+00> : vector<128x128xf32>
    %9 = tpu.matmul %8, %7, %cst_8 {dimension_numbers = #tpu.dot_dimension_numbers<[1], [0], [0], [1], [0, 0, 1, 1], [], []>} : vector<128x128xf32>, vector<128x128xf32>, vector<128x128xf32> -> vector<128x128xf32>
    %c0_9 = arith.constant 0 : index
    %c0_10 = arith.constant 0 : index
    %10 = vector.load %arg5[%c0_9, %c0_10] : memref<128x1xf32, #tpu.memory_space<vmem>>, vector<128x1xf32>
    %11 = vector.broadcast %10 : vector<128x1xf32> to vector<128x128xf32>
    %12 = arith.addf %9, %11 : vector<128x128xf32>
    %cst_11 = arith.constant 0.000000e+00 : f32
    %13 = vector.broadcast %cst_11 : f32 to vector<128x128xf32>
    %14 = arith.maximumf %12, %13 : vector<128x128xf32>
    %c0_12 = arith.constant 0 : index
    %c0_13 = arith.constant 0 : index
    %15 = vector.load %arg6[%c0_12, %c0_13] : memref<8x128xf32, #tpu.memory_space<vmem>>, vector<8x128xf32>
    %cst_14 = arith.constant dense<0.000000e+00> : vector<8x128xf32>
    %16 = tpu.matmul %15, %14, %cst_14 {dimension_numbers = #tpu.dot_dimension_numbers<[1], [0], [0], [1], [0, 0, 1, 1], [], []>} : vector<8x128xf32>, vector<128x128xf32>, vector<8x128xf32> -> vector<8x128xf32>
    %c0_15 = arith.constant 0 : index
    %c0_16 = arith.constant 0 : index
    %17 = vector.load %arg7[%c0_15, %c0_16] : memref<8x1xf32, #tpu.memory_space<vmem>>, vector<8x1xf32>
    %18 = vector.broadcast %17 : vector<8x1xf32> to vector<8x128xf32>
    %19 = arith.addf %16, %18 : vector<8x128xf32>
    %c0_17 = arith.constant 0 : index
    %c0_18 = arith.constant 0 : index
    %20 = vector.load %arg8[%c0_17, %c0_18] : memref<8x128xf32, #tpu.memory_space<vmem>>, vector<8x128xf32>
    tpu.vector_store %arg8[%c0_17, %c0_18], %19 {strides = array<i32>} : memref<8x128xf32, #tpu.memory_space<vmem>>, vector<8x128xf32>,
    return
  }
  func.func @transform_0(%arg0: i32) -> (i32, i32) {
    %c0_i32 = arith.constant 0 : i32
    %c0_i32_0 = arith.constant 0 : i32
    return %c0_i32, %arg0 : i32, i32
  }
  func.func @transform_1(%arg0: i32) -> (i32, i32) {
    %c0_i32 = arith.constant 0 : i32
    %c0_i32_0 = arith.constant 0 : i32
    %c0_i32_1 = arith.constant 0 : i32
    return %c0_i32, %c0_i32_0 : i32, i32
  }
  func.func @transform_2(%arg0: i32) -> (i32, i32) {
    %c0_i32 = arith.constant 0 : i32
    %c0_i32_0 = arith.constant 0 : i32
    %c0_i32_1 = arith.constant 0 : i32
    return %c0_i32, %c0_i32_0 : i32, i32
  }
  func.func @transform_3(%arg0: i32) -> (i32, i32) {
    %c0_i32 = arith.constant 0 : i32
    %c0_i32_0 = arith.constant 0 : i32
    %c0_i32_1 = arith.constant 0 : i32
    return %c0_i32, %c0_i32_0 : i32, i32
  }
  func.func @transform_4(%arg0: i32) -> (i32, i32) {
    %c0_i32 = arith.constant 0 : i32
    %c0_i32_0 = arith.constant 0 : i32
    %c0_i32_1 = arith.constant 0 : i32
    return %c0_i32, %c0_i32_0 : i32, i32
  }
  func.func @transform_5(%arg0: i32) -> (i32, i32) {
    %c0_i32 = arith.constant 0 : i32
    %c0_i32_0 = arith.constant 0 : i32
    %c0_i32_1 = arith.constant 0 : i32
    return %c0_i32, %c0_i32_0 : i32, i32
  }
  func.func @transform_6(%arg0: i32) -> (i32, i32) {
    %c0_i32 = arith.constant 0 : i32
    %c0_i32_0 = arith.constant 0 : i32
    %c0_i32_1 = arith.constant 0 : i32
    return %c0_i32, %c0_i32_0 : i32, i32
  }
  func.func @transform_7(%arg0: i32) -> (i32, i32) {
    %c0_i32 = arith.constant 0 : i32
    %c0_i32_0 = arith.constant 0 : i32
    return %c0_i32, %arg0 : i32, i32
  }
}

</mosaic_0001>

<bundles_post_ra>
// kernel: rnd_network_forward.1
= control target key start
LH: loop header
LB: loop body
LE: loop exit
PB: predicated region body
PF: predicated region fallthrough
CT: control target
= control target key end

     0   :  { %vm140_vm0 = vcmask 130048   ;;  %v973_v3 = vmov 0   ;;  %vm975_vm1 = vmmov 0   ;;  %s1248_s0 = inlined_call_operand.vmem [shape: f32[16,128], index: 0, kind: input, shape index: {}]   ;;  %s1249_s1 = inlined_call_operand.vmem [shape: f32[128,16], index: 1, kind: input, shape index: {}]   ;;  %s1250_s2 = inlined_call_operand.vmem [shape: f32[128,1], index: 2, kind: input, shape index: {}]   ;;  %s1251_s4 = inlined_call_operand.vmem [shape: f32[128,1], index: 4, kind: input, shape index: {}]   ;;  %s1252_s6 = inlined_call_operand.vmem [shape: f32[8,1], index: 6, kind: input, shape index: {}]   ;;  %s1253_s3 = inlined_call_operand.vmem [shape: f32[128,128], index: 3, kind: input, shape index: {}]   ;;  %s1254_s5 = inlined_call_operand.vmem [shape: f32[8,128], index: 5, kind: input, shape index: {}]   ;;  %s1255_s7 = inlined_call_operand.vmem [shape: f32[8,128], index: 7, kind: output, shape index: {}]  }
   0x1   :  { %v26_v0 = vld [vmem:[%s1248_s0] sm:$0xff]  ;;  %v27_v1 = vld [vmem:[%s1248_s0 + $0x8] sm:$0xff]  ;;  %971 = vset.pattern.permute.xlu0 %v973_v3  ;;  %972 = vset.pattern.permute.xlu1 %v973_v3  ;;  %v30_v7 = vld [vmem:[%s1249_s1 + $0x10] sm:$0xff] }
   0x2   :  { %v28_v2 = vld [vmem:[%s1249_s1] sm:$0xff]  ;;  %v907_v4 = vpack.c.bf16 %v27_v1, %v26_v0  ;;  %v29_v5 = vld [vmem:[%s1249_s1 + $0x8] sm:$0xff]  ;;  %v46_v9 = vld [vmem:[%s1250_s2 + $0x10] sm:$0xff] }
   0x3   :  { %792 = vmatprep.mubr.msk.f32.mxu0 %vm140_vm0, %v28_v2  ;;  %v44_v6 = vld [vmem:[%s1250_s2] sm:$0xff]  ;;  %v45_v8 = vld [vmem:[%s1250_s2 + $0x8] sm:$0xff]  ;;  %72 = vperm.xlu1 %972, %v46_v9   ;;  %v31_v10 = vld [vmem:[%s1249_s1 + $0x18] sm:$0xff] }
   0x4   :  { %908 = vmatprep.subr.bf16.mxu0 %v907_v4  ;;  %62 = vperm.xlu0 %971, %v44_v6   ;;  %v47_v11 = vld [vmem:[%s1250_s2 + $0x18] sm:$0xff]  ;;  %v32_v12 = vld [vmem:[%s1249_s1 + $0x20] sm:$0xff]  ;;  %v33_v14 = vld [vmem:[%s1249_s1 + $0x28] sm:$0xff] }
   0x5   :  { %910 = vmatpush3.bf16.msra.mxu0 %v907_v4  ;;  %v48_v13 = vld [vmem:[%s1250_s2 + $0x20] sm:$0xff]  ;;  %v49_v15 = vld [vmem:[%s1250_s2 + $0x28] sm:$0xff]  ;;  %v34_v16 = vld [vmem:[%s1249_s1 + $0x30] sm:$0xff] }
   0x6   :  { %v50_v17 = vld [vmem:[%s1250_s2 + $0x30] sm:$0xff]  ;;  %v35_v18 = vld [vmem:[%s1249_s1 + $0x38] sm:$0xff]  ;;  %v36_v20 = vld [vmem:[%s1249_s1 + $0x40] sm:$0xff] }
   0x7   :  { %77 = vperm.xlu1 %972, %v47_v11   ;;  %v51_v19 = vld [vmem:[%s1250_s2 + $0x38] sm:$0xff]  ;;  %v52_v21 = vld [vmem:[%s1250_s2 + $0x40] sm:$0xff]  ;;  %v37_v22 = vld [vmem:[%s1249_s1 + $0x48] sm:$0xff] }
   0x8   :  { %793 = vmatmul.mubr.msk.f32.vlgmr.msra.gmra.mrb[0].mxu0 %vm140_vm0, %v29_v5  ;;  %67 = vperm.xlu0 %971, %v45_v8   ;;  %v53_v23 = vld [vmem:[%s1250_s2 + $0x48] sm:$0xff]  ;;  %v38_v24 = vld [vmem:[%s1249_s1 + $0x50] sm:$0xff]  ;;  %v39_v26 = vld [vmem:[%s1249_s1 + $0x58] sm:$0xff] }
   0x9   :  { %795 = vmatprep.mubr.msk.f32.mxu0 %vm140_vm0, %v30_v7  ;;  %v54_v25 = vld [vmem:[%s1250_s2 + $0x50] sm:$0xff]  ;;  %v55_v27 = vld [vmem:[%s1250_s2 + $0x58] sm:$0xff]  ;;  %v40_v28 = vld [vmem:[%s1249_s1 + $0x60] sm:$0xff] }
   0xa   :  { %v56_v29 = vld [vmem:[%s1250_s2 + $0x60] sm:$0xff]  ;;  %v41_v30 = vld [vmem:[%s1249_s1 + $0x68] sm:$0xff]  ;;  %v42_v32 = vld [vmem:[%s1249_s1 + $0x70] sm:$0xff] }
   0xb   :  { %87 = vperm.xlu1 %972, %v49_v15   ;;  %v57_v31 = vld [vmem:[%s1250_s2 + $0x68] sm:$0xff]  ;;  %v58_v33 = vld [vmem:[%s1250_s2 + $0x70] sm:$0xff]  ;;  %v43_v34 = vld [vmem:[%s1249_s1 + $0x78] sm:$0xff] }
   0xc   :  { %796 = vmatmul.mubr.msk.f32.gmra.mrb[2].mxu0 %vm140_vm0, %v31_v10  ;;  %82 = vperm.xlu0 %971, %v48_v13   ;;  %v59_v35 = vld [vmem:[%s1250_s2 + $0x78] sm:$0xff]  ;;  %v366_v36 = vld [vmem:[%s1251_s4] sm:$0xff]  ;;  %v367_v37 = vld [vmem:[%s1251_s4 + $0x8] sm:$0xff] }
   0xd   :  { %798 = vmatprep.mubr.msk.f32.mxu0 %vm140_vm0, %v32_v12  ;;  %v368_v38 = vld [vmem:[%s1251_s4 + $0x10] sm:$0xff]  ;;  %v369_v39 = vld [vmem:[%s1251_s4 + $0x18] sm:$0xff]  ;;  %v370_v40 = vld [vmem:[%s1251_s4 + $0x20] sm:$0xff] }
   0xe   :  { %v371_v41 = vld [vmem:[%s1251_s4 + $0x28] sm:$0xff]  ;;  %v372_v42 = vld [vmem:[%s1251_s4 + $0x30] sm:$0xff]  ;;  %v373_v43 = vld [vmem:[%s1251_s4 + $0x38] sm:$0xff] }
   0xf   :  { %97 = vperm.xlu1 %972, %v51_v19   ;;  %v374_v44 = vld [vmem:[%s1251_s4 + $0x40] sm:$0xff]  ;;  %v375_v45 = vld [vmem:[%s1251_s4 + $0x48] sm:$0xff]  ;;  %v376_v46 = vld [vmem:[%s1251_s4 + $0x50] sm:$0xff] }
  0x10   :  { %799 = vmatmul.mubr.msk.f32.gmra.mrb[4].mxu0 %vm140_vm0, %v33_v14  ;;  %92 = vperm.xlu0 %971, %v50_v17   ;;  %v377_v47 = vld [vmem:[%s1251_s4 + $0x58] sm:$0xff]  ;;  %v378_v48 = vld [vmem:[%s1251_s4 + $0x60] sm:$0xff]  ;;  %v379_v49 = vld [vmem:[%s1251_s4 + $0x68] sm:$0xff] }
  0x11   :  { %801 = vmatprep.mubr.msk.f32.mxu0 %vm140_vm0, %v34_v16  ;;  %v380_v50 = vld [vmem:[%s1251_s4 + $0x70] sm:$0xff]  ;;  %v381_v51 = vld [vmem:[%s1251_s4 + $0x78] sm:$0xff]  ;;  %v624_v52 = vld [vmem:[%s1252_s6] sm:$0xff] }
  0x12   :  { %v350_v53 = vld [vmem:[%s1253_s3] sm:$0xff] }
  0x13   :  { %107 = vperm.xlu1 %972, %v53_v23   ;;  %848 = vmatprep.mubr.f32.mxu1 %v350_v53 }
  0x14   :  { %802 = vmatmul.mubr.msk.f32.gmra.mrb[6].mxu0 %vm140_vm0, %v35_v18  ;;  %102 = vperm.xlu0 %971, %v52_v21  }
  0x15   :  { %804 = vmatprep.mubr.msk.f32.mxu0 %vm140_vm0, %v36_v20 }
  0x17   :  { %117 = vperm.xlu1 %972, %v55_v27  }
  0x18   :  { %805 = vmatmul.mubr.msk.f32.gmra.mrb[8].mxu0 %vm140_vm0, %v37_v22  ;;  %112 = vperm.xlu0 %971, %v54_v25  }
  0x19   :  { %807 = vmatprep.mubr.msk.f32.mxu0 %vm140_vm0, %v38_v24 }
  0x1b   :  { %127 = vperm.xlu1 %972, %v57_v31  }
  0x1c   :  { %808 = vmatmul.mubr.msk.f32.gmra.mrb[10].mxu0 %vm140_vm0, %v39_v26  ;;  %122 = vperm.xlu0 %971, %v56_v29  }
  0x1d   :  { %810 = vmatprep.mubr.msk.f32.mxu0 %vm140_vm0, %v40_v28 }
  0x1f   :  { %137 = vperm.xlu1 %972, %v59_v35  }
  0x20   :  { %811 = vmatmul.mubr.msk.f32.gmra.mrb[12].mxu0 %vm140_vm0, %v41_v30  ;;  %132 = vperm.xlu0 %971, %v58_v33  }
  0x21   :  { %813 = vmatprep.mubr.msk.f32.mxu0 %vm140_vm0, %v42_v32 }
  0x23   :  { %389 = vperm.xlu1 %972, %v367_v37  }
  0x24   :  { %814 = vmatmul.mubr.msk.f32.gmra.mrb[14].mxu0 %vm140_vm0, %v43_v34  ;;  %384 = vperm.xlu0 %971, %v366_v36  }
  0x27   :  { %399 = vperm.xlu1 %972, %v369_v39  }
  0x28   :  { %394 = vperm.xlu0 %971, %v368_v38  }
  0x2b   :  { %409 = vperm.xlu1 %972, %v371_v41  }
  0x2c   :  { %404 = vperm.xlu0 %971, %v370_v40  }
  0x2f   :  { %419 = vperm.xlu1 %972, %v373_v43  }
  0x30   :  { %414 = vperm.xlu0 %971, %v372_v42  }
  0x33   :  { %429 = vperm.xlu1 %972, %v375_v45  }
  0x34   :  { %424 = vperm.xlu0 %971, %v374_v44  }
  0x37   :  { %439 = vperm.xlu1 %972, %v377_v47  }
  0x38   :  { %434 = vperm.xlu0 %971, %v376_v46  }
  0x3b   :  { %449 = vperm.xlu1 %972, %v379_v49  }
  0x3c   :  { %444 = vperm.xlu0 %971, %v378_v48  }
  0x3f   :  { %459 = vperm.xlu1 %972, %v381_v51  }
  0x40   :  { %454 = vperm.xlu0 %971, %v380_v50  }
  0x44   :  { %627 = vperm.xlu0 %971, %v624_v52  }
  0x82   :  { %v73_v54 = vpop.permute.xlu1 %72 }
  0x83   :  { %v63_v55 = vpop.permute.xlu0 %62 }
  0x86   :  { %v78_v56 = vpop.permute.xlu1 %77 }
  0x87   :  { %v68_v57 = vpop.permute.xlu0 %67 }
  0x8a   :  { %v88_v58 = vpop.permute.xlu1 %87 }
  0x8b   :  { %v83_v59 = vpop.permute.xlu0 %82 }
  0x8e   :  { %v98_v1 = vpop.permute.xlu1 %97 }
  0x8f   :  { %v93_v4 = vpop.permute.xlu0 %92 }
  0x92   :  { %v108_v14 = vpop.permute.xlu1 %107 }
  0x93   :  { %v103_v17 = vpop.permute.xlu0 %102 }
  0x96   :  { %v118_v26 = vpop.permute.xlu1 %117 }
  0x97   :  { %v113_v29 = vpop.permute.xlu0 %112 }
  0x9a   :  { %v128_v39 = vpop.permute.xlu1 %127 }
  0x9b   :  { %v123_v42 = vpop.permute.xlu0 %122 }
  0x9e   :  { %v138_v51 = vpop.permute.xlu1 %137 }
  0xdb   :  { %v794_v60 = vpop.f32.mrb[0].mxu0 }
  0xdc   :  { %v261_v61 = vadd.f32 %v794_v60, %v68_v57  ;;  %v255_v62 = vpop.f32.mrb[1].mxu0 }
  0xdd   :  { %v256_v63 = vadd.f32 %v255_v62, %v63_v55  ;;  %v351_v62 = vld [vmem:[%s1253_s3 + $0x8] sm:$0xff] }
  0xde   :  { %v335_v0 = vmax.f32 %v261_v61, 0.0 }
  0xdf   :  { %v334_v2 = vmax.f32 %v256_v63, 0.0  ;;  %v797_v3 = vpop.f32.mrb[2].mxu0  ;;  %v352_v63 = vld [vmem:[%s1253_s3 + $0x10] sm:$0xff] }
  0xe0   :  { %v271_v5 = vadd.f32 %v797_v3, %v78_v56  ;;  %v265_v6 = vpop.f32.mrb[3].mxu0  ;;  %v356_v3 = vld [vmem:[%s1253_s3 + $0x30] sm:$0xff] }
  0xe1   :  { %v266_v7 = vadd.f32 %v265_v6, %v73_v54  ;;  %v911_v8 = vpack.c.bf16 %v335_v0, %v334_v2  ;;  %v133_v54 = vpop.permute.xlu0 %132  ;;  %v353_v0 = vld [vmem:[%s1253_s3 + $0x18] sm:$0xff]  ;;  %v355_v2 = vld [vmem:[%s1253_s3 + $0x28] sm:$0xff] }
  0xe2   :  { %v337_v9 = vmax.f32 %v271_v5, 0.0  ;;  %v358_v5 = vld [vmem:[%s1253_s3 + $0x40] sm:$0xff]  ;;  %v359_v6 = vld [vmem:[%s1253_s3 + $0x48] sm:$0xff] }
  0xe3   :  { %v336_v10 = vmax.f32 %v266_v7, 0.0  ;;  %v800_v11 = vpop.f32.mrb[4].mxu0  ;;  %912 = vmatprep.subr.bf16.mxu1 %v911_v8  ;;  %v360_v7 = vld [vmem:[%s1253_s3 + $0x50] sm:$0xff] }
  0xe4   :  { %v281_v12 = vadd.f32 %v800_v11, %v88_v58  ;;  %v275_v13 = vpop.f32.mrb[5].mxu0  ;;  %914 = vmatpush3.bf16.msra.mxu1 %v911_v8  ;;  %v361_v8 = vld [vmem:[%s1253_s3 + $0x58] sm:$0xff]  ;;  %v364_v11 = vld [vmem:[%s1253_s3 + $0x70] sm:$0xff] }
  0xe5   :  { %v915_v15 = vpack.c.bf16 %v337_v9, %v336_v10  ;;  %v276_v16 = vadd.f32 %v275_v13, %v83_v59  ;;  %v362_v9 = vld [vmem:[%s1253_s3 + $0x60] sm:$0xff]  ;;  %v363_v10 = vld [vmem:[%s1253_s3 + $0x68] sm:$0xff]  ;;  %v974_v13 = vmov 0.0|0.0  }
  0xe6   :  { %v339_v18 = vmax.f32 %v281_v12, 0.0  ;;  %v365_v12 = vld [vmem:[%s1253_s3 + $0x78] sm:$0xff]  ;;  %943 = vmatprep.subr.bf16.mxu0 %v974_v13 }
  0xe7   :  { %v338_v19 = vmax.f32 %v276_v16, 0.0  ;;  %v803_v20 = vpop.f32.mrb[6].mxu0  ;;  %916 = vmatprep.subr.bf16.mxu1 %v915_v15  ;;  %v385_v16 = vpop.permute.xlu0 %384 }
  0xe8   :  { %v291_v21 = vadd.f32 %v803_v20, %v98_v1  ;;  %v285_v22 = vpop.f32.mrb[7].mxu0  ;;  %918 = vmatpush3.bf16.msra.mxu1 %v915_v15  ;;  %v354_v1 = vld [vmem:[%s1253_s3 + $0x20] sm:$0xff]  ;;  %v390_v15 = vpop.permute.xlu1 %389 }
  0xe9   :  { %v919_v23 = vpack.c.bf16 %v339_v18, %v338_v19  ;;  %v286_v24 = vadd.f32 %v285_v22, %v93_v4  ;;  %v357_v4 = vld [vmem:[%s1253_s3 + $0x38] sm:$0xff] }
  0xea   :  { %v341_v25 = vmax.f32 %v291_v21, 0.0 }
  0xeb   :  { %v340_v27 = vmax.f32 %v286_v24, 0.0  ;;  %v806_v28 = vpop.f32.mrb[8].mxu0  ;;  %920 = vmatprep.subr.bf16.mxu1 %v919_v23  ;;  %v395_v18 = vpop.permute.xlu0 %394 }
  0xec   :  { %v301_v30 = vadd.f32 %v806_v28, %v108_v14  ;;  %v295_v31 = vpop.f32.mrb[9].mxu0  ;;  %922 = vmatpush3.bf16.msra.mxu1 %v919_v23  ;;  %v976_v14 = vmov 0.0  }
  0xed   :  { %v923_v32 = vpack.c.bf16 %v341_v25, %v340_v27  ;;  %v296_v33 = vadd.f32 %v295_v31, %v103_v17  ;;  %904 = vmatprep.mubr.msk.f32.mxu0 %vm975_vm1, %v976_v14  ;;  %v400_v17 = vpop.permute.xlu1 %399 }
  0xee   :  { %v343_v34 = vmax.f32 %v301_v30, 0.0 }
  0xef   :  { %v342_v35 = vmax.f32 %v296_v33, 0.0  ;;  %v809_v36 = vpop.f32.mrb[10].mxu0  ;;  %924 = vmatprep.subr.bf16.mxu1 %v923_v32  ;;  %v405_v20 = vpop.permute.xlu0 %404 }
  0xf0   :  { %v311_v37 = vadd.f32 %v809_v36, %v118_v26  ;;  %v305_v38 = vpop.f32.mrb[11].mxu0  ;;  %926 = vmatpush3.bf16.msra.mxu1 %v923_v32 }
  0xf1   :  { %v927_v40 = vpack.c.bf16 %v343_v34, %v342_v35  ;;  %v306_v41 = vadd.f32 %v305_v38, %v113_v29  ;;  %v410_v19 = vpop.permute.xlu1 %409 }
  0xf2   :  { %v345_v43 = vmax.f32 %v311_v37, 0.0 }
  0xf3   :  { %v344_v44 = vmax.f32 %v306_v41, 0.0  ;;  %v812_v45 = vpop.f32.mrb[12].mxu0  ;;  %928 = vmatprep.subr.bf16.mxu1 %v927_v40  ;;  %v415_v29 = vpop.permute.xlu0 %414 }
  0xf4   :  { %v321_v46 = vadd.f32 %v812_v45, %v128_v39  ;;  %v315_v47 = vpop.f32.mrb[13].mxu0  ;;  %930 = vmatpush3.bf16.msra.mxu1 %v927_v40 }
  0xf5   :  { %v931_v48 = vpack.c.bf16 %v345_v43, %v344_v44  ;;  %v316_v49 = vadd.f32 %v315_v47, %v123_v42  ;;  %v420_v26 = vpop.permute.xlu1 %419 }
  0xf6   :  { %v347_v50 = vmax.f32 %v321_v46, 0.0 }
  0xf7   :  { %v346_v52 = vmax.f32 %v316_v49, 0.0  ;;  %v815_v53 = vpop.f32.mrb[14].mxu0  ;;  %932 = vmatprep.subr.bf16.mxu1 %v931_v48  ;;  %v425_v42 = vpop.permute.xlu0 %424 }
  0xf8   :  { %v331_v55 = vadd.f32 %v815_v53, %v138_v51  ;;  %v325_v56 = vpop.f32.mrb[15].mxu0  ;;  %934 = vmatpush3.bf16.msra.mxu1 %v931_v48 }
  0xf9   :  { %v935_v57 = vpack.c.bf16 %v347_v50, %v346_v52  ;;  %v326_v58 = vadd.f32 %v325_v56, %v133_v54  ;;  %v430_v39 = vpop.permute.xlu1 %429 }
  0xfa   :  { %v349_v59 = vmax.f32 %v331_v55, 0.0 }
  0xfb   :  { %v348_v60 = vmax.f32 %v326_v58, 0.0  ;;  %936 = vmatprep.subr.bf16.mxu1 %v935_v57  ;;  %v435_v54 = vpop.permute.xlu0 %434 }
  0xfc   :  { %938 = vmatpush3.bf16.msra.mxu1 %v935_v57 }
  0xfd   :  { %v939_v61 = vpack.c.bf16 %v349_v59, %v348_v60  ;;  %v440_v51 = vpop.permute.xlu1 %439 }
  0xff   :  { %940 = vmatprep.subr.bf16.mxu1 %v939_v61 }
 0x100   :  { %942 = vmatpush3.bf16.msra.mxu1 %v939_v61 }
 0x103   :  { %849 = vmatmul.mubr.f32.vlgmr.msra.gmra.mrb[0].mxu1 %v351_v62 }
 0x104   :  { %851 = vmatprep.mubr.f32.mxu1 %v352_v63 }
 0x107   :  { %852 = vmatmul.mubr.f32.gmra.mrb[2].mxu1 %v353_v0  ;;  %v450_v0 = vpop.permute.xlu1 %449 }
 0x108   :  { %854 = vmatprep.mubr.f32.mxu1 %v354_v1 }
 0x10b   :  { %855 = vmatmul.mubr.f32.gmra.mrb[4].mxu1 %v355_v2 }
 0x10c   :  { %857 = vmatprep.mubr.f32.mxu1 %v356_v3  ;;  %v445_v3 = vpop.permute.xlu0 %444 }
 0x10f   :  { %858 = vmatmul.mubr.f32.gmra.mrb[6].mxu1 %v357_v4 }
 0x110   :  { %860 = vmatprep.mubr.f32.mxu1 %v358_v5 }
 0x113   :  { %861 = vmatmul.mubr.f32.gmra.mrb[8].mxu1 %v359_v6 }
 0x114   :  { %863 = vmatprep.mubr.f32.mxu1 %v360_v7 }
 0x117   :  { %864 = vmatmul.mubr.f32.gmra.mrb[10].mxu1 %v361_v8 }
 0x118   :  { %866 = vmatprep.mubr.f32.mxu1 %v362_v9 }
 0x11b   :  { %867 = vmatmul.mubr.f32.gmra.mrb[12].mxu1 %v363_v10 }
 0x11c   :  { %869 = vmatprep.mubr.f32.mxu1 %v364_v11 }
 0x11f   :  { %870 = vmatmul.mubr.f32.gmra.mrb[14].mxu1 %v365_v12  ;;  %v460_v12 = vpop.permute.xlu1 %459 }
 0x1d6   :  { %v850_v21 = vpop.f32.mrb[0].mxu1 }
 0x1d7   :  { %v534_v22 = vadd.f32 %v850_v21, %v390_v15  ;;  %v528_v23 = vpop.f32.mrb[1].mxu1 }
 0x1d8   :  { %v529_v24 = vadd.f32 %v528_v23, %v385_v16  ;;  %v455_v16 = vpop.permute.xlu0 %454 }
 0x1d9   :  { %v608_v25 = vmax.f32 %v534_v22, 0.0 }
 0x1da   :  { %v607_v27 = vmax.f32 %v529_v24, 0.0  ;;  %v853_v28 = vpop.f32.mrb[2].mxu1  ;;  %v623_v24 = vld [vmem:[%s1254_s5] sm:$0xff] }
 0x1db   :  { %v544_v30 = vadd.f32 %v853_v28, %v400_v17  ;;  %v538_v31 = vpop.f32.mrb[3].mxu1 }
 0x1dc   :  { %v944_v32 = vpack.c.bf16 %v608_v25, %v607_v27  ;;  %v539_v33 = vadd.f32 %v538_v31, %v395_v18  ;;  %v628_v25 = vpop.permute.xlu0 %627 }
 0x1dd   :  { %v610_v34 = vmax.f32 %v544_v30, 0.0 }
 0x1de   :  { %v609_v35 = vmax.f32 %v539_v33, 0.0  ;;  %v856_v36 = vpop.f32.mrb[4].mxu1  ;;  %945 = vmatpush3.bf16.msra.mxu0 %v944_v32 }
 0x1df   :  { %v554_v37 = vadd.f32 %v856_v36, %v410_v19  ;;  %v548_v38 = vpop.f32.mrb[5].mxu1  ;;  %946 = vmatprep.subr.bf16.mxu0 %v974_v13 }
 0x1e0   :  { %v947_v40 = vpack.c.bf16 %v610_v34, %v609_v35  ;;  %v549_v41 = vadd.f32 %v548_v38, %v405_v20 }
 0x1e1   :  { %v612_v43 = vmax.f32 %v554_v37, 0.0 }
 0x1e2   :  { %v611_v44 = vmax.f32 %v549_v41, 0.0  ;;  %v859_v45 = vpop.f32.mrb[6].mxu1  ;;  %948 = vmatpush3.bf16.msra.mxu0 %v947_v40 }
 0x1e3   :  { %v564_v46 = vadd.f32 %v859_v45, %v420_v26  ;;  %v558_v47 = vpop.f32.mrb[7].mxu1  ;;  %949 = vmatprep.subr.bf16.mxu0 %v974_v13 }
 0x1e4   :  { %v950_v48 = vpack.c.bf16 %v612_v43, %v611_v44  ;;  %v559_v49 = vadd.f32 %v558_v47, %v415_v29 }
 0x1e5   :  { %v614_v50 = vmax.f32 %v564_v46, 0.0 }
 0x1e6   :  { %v613_v52 = vmax.f32 %v559_v49, 0.0  ;;  %v862_v53 = vpop.f32.mrb[8].mxu1  ;;  %951 = vmatpush3.bf16.msra.mxu0 %v950_v48 }
 0x1e7   :  { %v574_v55 = vadd.f32 %v862_v53, %v430_v39  ;;  %v568_v56 = vpop.f32.mrb[9].mxu1  ;;  %952 = vmatprep.subr.bf16.mxu0 %v974_v13 }
 0x1e8   :  { %v953_v57 = vpack.c.bf16 %v614_v50, %v613_v52  ;;  %v569_v58 = vadd.f32 %v568_v56, %v425_v42 }
 0x1e9   :  { %v616_v59 = vmax.f32 %v574_v55, 0.0 }
 0x1ea   :  { %v615_v60 = vmax.f32 %v569_v58, 0.0  ;;  %v865_v61 = vpop.f32.mrb[10].mxu1  ;;  %954 = vmatpush3.bf16.msra.mxu0 %v953_v57 }
 0x1eb   :  { %v584_v62 = vadd.f32 %v865_v61, %v440_v51  ;;  %v578_v63 = vpop.f32.mrb[11].mxu1  ;;  %955 = vmatprep.subr.bf16.mxu0 %v974_v13 }
 0x1ec   :  { %v956_v1 = vpack.c.bf16 %v616_v59, %v615_v60  ;;  %v579_v2 = vadd.f32 %v578_v63, %v435_v54 }
 0x1ed   :  { %v618_v4 = vmax.f32 %v584_v62, 0.0 }
 0x1ee   :  { %v617_v5 = vmax.f32 %v579_v2, 0.0  ;;  %v868_v6 = vpop.f32.mrb[12].mxu1  ;;  %957 = vmatpush3.bf16.msra.mxu0 %v956_v1 }
 0x1ef   :  { %v594_v7 = vadd.f32 %v868_v6, %v450_v0  ;;  %v588_v8 = vpop.f32.mrb[13].mxu1  ;;  %958 = vmatprep.subr.bf16.mxu0 %v974_v13 }
 0x1f0   :  { %v959_v9 = vpack.c.bf16 %v618_v4, %v617_v5  ;;  %v589_v10 = vadd.f32 %v588_v8, %v445_v3 }
 0x1f1   :  { %v620_v11 = vmax.f32 %v594_v7, 0.0 }
 0x1f2   :  { %v619_v14 = vmax.f32 %v589_v10, 0.0  ;;  %v871_v15 = vpop.f32.mrb[14].mxu1  ;;  %960 = vmatpush3.bf16.msra.mxu0 %v959_v9 }
 0x1f3   :  { %v604_v17 = vadd.f32 %v871_v15, %v460_v12  ;;  %v598_v18 = vpop.f32.mrb[15].mxu1  ;;  %961 = vmatprep.subr.bf16.mxu0 %v974_v13 }
 0x1f4   :  { %v962_v19 = vpack.c.bf16 %v620_v11, %v619_v14  ;;  %v599_v20 = vadd.f32 %v598_v18, %v455_v16 }
 0x1f5   :  { %v622_v21 = vmax.f32 %v604_v17, 0.0 }
 0x1f6   :  { %v621_v22 = vmax.f32 %v599_v20, 0.0  ;;  %963 = vmatpush3.bf16.msra.mxu0 %v962_v19 }
 0x1f7   :  { %964 = vmatprep.subr.bf16.mxu0 %v974_v13 }
 0x1f8   :  { %v965_v23 = vpack.c.bf16 %v622_v21, %v621_v22 }
 0x1fa   :  { %966 = vmatpush3.bf16.msra.mxu0 %v965_v23 }
 0x1fd   :  { %905 = vmatmul.mubr.f32.vlgmr.msra.gmra.mrb[16].mxu0 %v623_v24 }
 0x2d0   :  { %v696_v26 = vpop.f32.mrb[16].mxu0 }
 0x2d1   :  { %v697_v27 = vadd.f32 %v696_v26, %v628_v25  ;;  %v906_v28 = vpop.f32.mrb[17].mxu0 }
 0x2d3   :  { %700 = vst [vmem:[%s1255_s7] sm:$0xff] %v697_v27 }

</bundles_post_ra>
